<compile_context>
chip_gen: v6e
topology: v6e:2x2x1
jax: 0.10.0
libtpu: 0.0.40
codegen_flags: <defaults>
</compile_context>

<pallas_src>
import jax
import jax.numpy as jnp
from jax.experimental import pallas as pl
from jax.experimental.pallas import tpu as pltpu


def _round_up(x, m):
    return (x + m - 1) // m * m


# Leave headroom below the smallest physical VMEM (v7x: 64 MiB per TensorCore).
_VMEM_CLAMP = 48 * 2**20


# ----------------------------------------------------------------------------
# Kernel 1: batched layer-0 input gate precompute  (slen*bs, E) @ (E, 4H) + b
# ----------------------------------------------------------------------------
def _input_proj_kernel(x_ref, w_ref, b_ref, o_ref):
    w = w_ref[...]
    x = x_ref[...].astype(w.dtype)
    o_ref[...] = jnp.dot(x, w, preferred_element_type=jnp.float32) + b_ref[...]


def _input_gates_pallas(x2d, w_t, b):
    """x2d: (M, E) f32, w_t: (E, 4H) (bf16/f32), b: (1, 4H) f32 -> (M, 4H) f32."""
    M, E = x2d.shape
    G = w_t.shape[1]

    # Large, lane/sublane-dense MXU tile, decoupled from the recurrence tiling.
    tm = min(512, _round_up(M, 128))
    M_pad = _round_up(M, tm)
    if M_pad != M:
        x2d = jnp.zeros((M_pad, E), x2d.dtype).at[:M].set(x2d)

    itemsize_w = jnp.dtype(w_t.dtype).itemsize
    vmem = 2 * (tm * E * 4 + tm * G * 4)          # double-buffered x / out blocks
    vmem += 2 * (E * G * itemsize_w + G * 4)      # resident weight + bias
    vmem = int(min(vmem + 16 * 2**20, _VMEM_CLAMP))

    out = pl.pallas_call(
        _input_proj_kernel,
        out_shape=jax.ShapeDtypeStruct((M_pad, G), jnp.float32),
        grid_spec=pltpu.PrefetchScalarGridSpec(
            num_scalar_prefetch=0,
            grid=(M_pad // tm,),
            in_specs=[
                pl.BlockSpec((tm, E), lambda i: (i, 0)),
                pl.BlockSpec((E, G), lambda i: (0, 0)),
                pl.BlockSpec((1, G), lambda i: (0, 0)),
            ],
            out_specs=pl.BlockSpec((tm, G), lambda i: (i, 0)),
        ),
        compiler_params=pltpu.CompilerParams(
            dimension_semantics=("parallel",),
            vmem_limit_bytes=vmem,
        ),
    )(x2d, w_t, b)
    return out[:M]


# ----------------------------------------------------------------------------
# Kernel 2: multi-layer LSTM recurrence
#   grid = (batch blocks ["parallel"], time blocks ["arbitrary"])
#   t_blk timesteps per grid step; h/c carried locally inside the block.
# ----------------------------------------------------------------------------
def _make_encoder_lstm_kernel(n_layers, hidden_dim, t_blk):
    H = hidden_dim
    n_deep = n_layers - 1

    def kernel(*refs):
        gin0_ref = refs[0]                       # (t_blk, bs_blk, 4H) f32: emb@Wih0^T + b0
        whh0_ref = refs[1]                       # (H, 4H)
        deep_refs = refs[2:2 + 3 * n_deep]       # per layer>=1: wih^T (H,4H), whh^T (H,4H), b (1,4H)
        out_ref = refs[2 + 3 * n_deep]           # (t_blk, bs_blk, H) top-layer h stream
        h_sc = refs[3 + 3 * n_deep]              # (L, bs_blk, H) f32
        c_sc = refs[4 + 3 * n_deep]              # (L, bs_blk, H) f32

        t_idx = pl.program_id(1)                 # time axis (innermost, "arbitrary")

        @pl.when(t_idx == 0)
        def _init():
            # nn.LSTM default: zero initial (h, c); re-keyed on the time axis so
            # each batch block (possibly on a different TensorCore) starts fresh.
            h_sc[...] = jnp.zeros_like(h_sc)
            c_sc[...] = jnp.zeros_like(c_sc)

        # Hoist weight / bias loads out of the time loop.
        whh0 = whh0_ref[...]
        deep_wih = [deep_refs[3 * i][...] for i in range(n_deep)]
        deep_whh = [deep_refs[3 * i + 1][...] for i in range(n_deep)]
        cdt = whh0.dtype                         # MXU input dtype (bf16)
        bs_blk = h_sc.shape[1]
        # Hoisted bias broadcast (JAX does not CSE broadcast_in_dim).
        deep_b = [jnp.broadcast_to(deep_refs[3 * i + 2][...], (bs_blk, 4 * H))
                  for i in range(n_deep)]

        # Carry h/c as local values across the unrolled time loop; single
        # scratch write-back per grid step.
        h = [h_sc[l] for l in range(n_layers)]
        c = [c_sc[l] for l in range(n_layers)]

        def lstm_cell(gates, c_prev):
            # PyTorch LSTM gate order: input, forget, cell(g), output
            i_g = jax.nn.sigmoid(gates[:, 0 * H:1 * H])
            f_g = jax.nn.sigmoid(gates[:, 1 * H:2 * H])
            g_g = jnp.tanh(gates[:, 2 * H:3 * H])
            o_g = jax.nn.sigmoid(gates[:, 3 * H:4 * H])
            c_new = f_g * c_prev + i_g * g_g
            h_new = o_g * jnp.tanh(c_new)
            return h_new, c_new

        for i in range(t_blk):
            # layer 0: input contribution (incl. bias) precomputed outside the kernel
            gates0 = gin0_ref[i] + jnp.dot(h[0].astype(cdt), whh0,
                                           preferred_element_type=jnp.float32)
            h[0], c[0] = lstm_cell(gates0, c[0])
            x = h[0]

            # deeper layers: two bf16 dots summed in f32 (no concat on the crit path)
            for l in range(1, n_layers):
                gates = (jnp.dot(x.astype(cdt), deep_wih[l - 1],
                                 preferred_element_type=jnp.float32)
                         + jnp.dot(h[l].astype(cdt), deep_whh[l - 1],
                                   preferred_element_type=jnp.float32)
                         + deep_b[l - 1])
                h[l], c[l] = lstm_cell(gates, c[l])
                x = h[l]

            out_ref[i] = x   # top-layer h_t (lane-dense: last dim = H = 128)

        # single write-back of carried state for the next time block
        for l in range(n_layers):
            h_sc[l] = h[l]
            c_sc[l] = c[l]

    return kernel


# ----------------------------------------------------------------------------
# Wrapper: Encoder.forward
# ----------------------------------------------------------------------------
def encoder_forward_pallas(x_ids, lengths, emb_table, lstm_params_pt, proj_w, proj_b,
                           *, t_blk=16, bs_blk=8, weight_dtype=jnp.bfloat16):
    """
    x_ids:          (slen, bs)   int32 word indices
    lengths:        (bs,)        int32 sentence lengths (max == slen)
    emb_table:      (n_words, E) f32
    lstm_params_pt: per layer (w_ih (4H,in), w_hh (4H,H), b_ih (4H,), b_hh (4H,))
    proj_w:         (enc_dim, H) f32, proj_b: (enc_dim,) f32
    returns (latent (bs, enc_dim) f32, lstm_output (slen, bs, H) f32)
    """
    slen, bs = x_ids.shape
    E = emb_table.shape[1]
    H = lstm_params_pt[0][1].shape[1]
    L = len(lstm_params_pt)

    # --- glue: embedding lookup (dropout identity in eval mode) ---
    # TODO(synk): training-mode dropout and the 3-D soft-input path are not implemented.
    emb = emb_table[x_ids]                                        # (slen, bs, E)

    # --- pad batch to batch-block multiple (sublane 8) and time to T-block multiple ---
    bs_p = _round_up(bs, bs_blk)
    slen_p = _round_up(slen, t_blk)
    emb_p = jnp.zeros((slen_p, bs_p, E), jnp.float32).at[:slen, :bs].set(emb)

    # --- preprocess weights (bf16 matrices, f32 biases, layer-0 bias folded) ---
    w_ih0, w_hh0, b_ih0, b_hh0 = lstm_params_pt[0]
    wih0_t = w_ih0.T.astype(weight_dtype)                         # (E, 4H)
    whh0_t = w_hh0.T.astype(weight_dtype)                         # (H, 4H)
    b0 = (b_ih0 + b_hh0)[None, :].astype(jnp.float32)             # (1, 4H)

    deep_flat = []
    for l in range(1, L):
        w_ih, w_hh, b_ih, b_hh = lstm_params_pt[l]
        deep_flat += [w_ih.T.astype(weight_dtype),                # (H, 4H)
                      w_hh.T.astype(weight_dtype),                # (H, 4H)
                      (b_ih + b_hh)[None, :].astype(jnp.float32)] # (1, 4H)

    # --- batched layer-0 input gate precompute (hoisted out of the recurrence) ---
    gin0 = _input_gates_pallas(emb_p.reshape(slen_p * bs_p, E), wih0_t, b0)
    gin0 = gin0.reshape(slen_p, bs_p, 4 * H)

    # --- recurrent kernel ---
    n_bblk = bs_p // bs_blk
    n_tblk = slen_p // t_blk

    in_specs = [
        pl.BlockSpec((t_blk, bs_blk, 4 * H), lambda b, t: (t, b, 0)),  # gate inputs
        pl.BlockSpec(whh0_t.shape, lambda b, t: (0, 0)),               # resident weights
    ]
    for arr in deep_flat:
        in_specs.append(pl.BlockSpec(arr.shape, lambda b, t: (0, 0)))
    out_spec = pl.BlockSpec((t_blk, bs_blk, H), lambda b, t: (t, b, 0))

    # explicit VMEM budget: double-buffered blocks + resident weights + scratch + headroom
    itemsize_w = jnp.dtype(weight_dtype).itemsize
    vmem = 2 * (t_blk * bs_blk * 4 * H * 4 + t_blk * bs_blk * H * 4)
    vmem += 2 * (H * 4 * H * itemsize_w
                 + sum(int(a.size) * a.dtype.itemsize for a in deep_flat))
    vmem += 2 * L * bs_blk * H * 4
    vmem = int(min(vmem + 16 * 2**20, _VMEM_CLAMP))

    kernel = _make_encoder_lstm_kernel(L, H, t_blk)
    lstm_out = pl.pallas_call(
        kernel,
        out_shape=jax.ShapeDtypeStruct((slen_p, bs_p, H), jnp.float32),
        grid_spec=pltpu.PrefetchScalarGridSpec(
            num_scalar_prefetch=0,
            grid=(n_bblk, n_tblk),
            in_specs=in_specs,
            out_specs=out_spec,
            scratch_shapes=[
                pltpu.VMEM((L, bs_blk, H), jnp.float32),   # h state, carried across time
                pltpu.VMEM((L, bs_blk, H), jnp.float32),   # c state
            ],
        ),
        compiler_params=pltpu.CompilerParams(
            # batch blocks independent (megacore on v7x); time carries state via scratch
            dimension_semantics=("parallel", "arbitrary"),
            vmem_limit_bytes=vmem,
        ),
    )(gin0, whh0_t, *deep_flat)

    lstm_out = lstm_out[:slen, :bs]                      # (slen, bs, H)

    # --- glue: masked-select of last valid output + projection (proj_mode='proj') ---
    # TODO(synk): proj_mode='pool' (max over time) and 'last' variants not implemented.
    h_t = lstm_out[lengths - 1, jnp.arange(bs)]          # (bs, H)
    latent = h_t @ proj_w.T + proj_b                     # (bs, enc_dim)
    return latent, lstm_out


# ----------------------------------------------------------------------------
# Pure-JAX reference (PyTorch nn.LSTM math) for correctness check
# ----------------------------------------------------------------------------
def encoder_forward_reference(x_ids, lengths, emb_table, lstm_params_pt, proj_w, proj_b):
    slen, bs = x_ids.shape
    H = lstm_params_pt[0][1].shape[1]
    L = len(lstm_params_pt)
    emb = emb_table[x_ids]
    h = [jnp.zeros((bs, H), jnp.float32) for _ in range(L)]
    c = [jnp.zeros((bs, H), jnp.float32) for _ in range(L)]
    outs = []
    for t in range(slen):
        x = emb[t]
        for l in range(L):
            w_ih, w_hh, b_ih, b_hh = lstm_params_pt[l]
            gates = x @ w_ih.T + h[l] @ w_hh.T + b_ih + b_hh
            i_g = jax.nn.sigmoid(gates[:, 0 * H:1 * H])
            f_g = jax.nn.sigmoid(gates[:, 1 * H:2 * H])
            g_g = jnp.tanh(gates[:, 2 * H:3 * H])
            o_g = jax.nn.sigmoid(gates[:, 3 * H:4 * H])
            c[l] = f_g * c[l] + i_g * g_g
            h[l] = o_g * jnp.tanh(c[l])
            x = h[l]
        outs.append(x)
    lstm_out = jnp.stack(outs, axis=0)
    h_t = lstm_out[lengths - 1, jnp.arange(bs)]
    latent = h_t @ proj_w.T + proj_b
    return latent, lstm_out


if __name__ == "__main__":
    # ---- small, deterministic config ----
    slen, bs = 16, 4
    n_words = 256
    emb_dim = 128
    hidden_dim = 128
    enc_dim = 128            # proj_mode='proj'
    n_enc_layers = 2
    pad_index = 2
    t_blk = 16

    key = jax.random.PRNGKey(0)
    keys = jax.random.split(key, 16)

    # embeddings table: normal(0, 0.1), pad row zeroed (as in __init__)
    emb_table = 0.1 * jax.random.normal(keys[0], (n_words, emb_dim), jnp.float32)
    emb_table = emb_table.at[pad_index].set(0.0)

    x_ids = jax.random.randint(keys[1], (slen, bs), 0, n_words, dtype=jnp.int32)
    lengths = jax.random.randint(keys[2], (bs,), 1, slen + 1, dtype=jnp.int32)
    lengths = lengths.at[0].set(slen)            # module asserts lengths.max() == slen
    assert int(lengths.max()) == slen

    # LSTM parameters in PyTorch layout
    lstm_params = []
    kidx = 3
    scale = 1.0 / jnp.sqrt(hidden_dim)
    for l in range(n_enc_layers):
        in_dim = emb_dim if l == 0 else hidden_dim
        w_ih = scale * jax.random.normal(keys[kidx], (4 * hidden_dim, in_dim), jnp.float32); kidx += 1
        w_hh = scale * jax.random.normal(keys[kidx], (4 * hidden_dim, hidden_dim), jnp.float32); kidx += 1
        b_ih = scale * jax.random.normal(keys[kidx], (4 * hidden_dim,), jnp.float32); kidx += 1
        b_hh = scale * jax.random.normal(keys[kidx], (4 * hidden_dim,), jnp.float32); kidx += 1
        lstm_params.append((w_ih, w_hh, b_ih, b_hh))

    # output projection (proj_mode='proj'): Linear(hidden_dim, enc_dim)
    proj_w = scale * jax.random.normal(keys[kidx], (enc_dim, hidden_dim), jnp.float32); kidx += 1
    proj_b = scale * jax.random.normal(keys[kidx], (enc_dim,), jnp.float32); kidx += 1

    # ---- run Pallas pipeline ----
    latent, lstm_out = encoder_forward_pallas(
        x_ids, lengths, emb_table, lstm_params, proj_w, proj_b,
        t_blk=t_blk, weight_dtype=jnp.bfloat16)
    latent = jax.block_until_ready(latent)
    assert latent.shape == (bs, enc_dim)
    assert lstm_out.shape == (slen, bs, hidden_dim)

    # ---- verify against pure-JAX reference ----
    # Reference uses the same bf16-rounded weight matrices (biases stay f32) so the
    # check isolates kernel correctness from intentional weight quantization.
    rounded = [(w_ih.astype(jnp.bfloat16).astype(jnp.float32),
                w_hh.astype(jnp.bfloat16).astype(jnp.float32),
                b_ih, b_hh) for (w_ih, w_hh, b_ih, b_hh) in lstm_params]
    latent_ref, lstm_out_ref = encoder_forward_reference(
        x_ids, lengths, emb_table, rounded, proj_w, proj_b)
    latent_ref = jax.block_until_ready(latent_ref)

    err_h = jnp.max(jnp.abs(lstm_out - lstm_out_ref))
    err_l = jnp.max(jnp.abs(latent - latent_ref))
    assert jnp.allclose(lstm_out, lstm_out_ref, rtol=2e-2, atol=2e-2), \
        f"lstm_output max abs diff {err_h}"
    assert jnp.allclose(latent, latent_ref, rtol=2e-2, atol=2e-2), \
        f"latent max abs diff {err_l}"

    print("KERNEL_OK")
</pallas_src>

<mosaic_0001>
module attributes {stable_mosaic.version = 11 : i64} {
  func.func @_input_proj_kernel(%arg0: i32, %arg1: memref<128x128xf32, #tpu.memory_space<vmem>>, %arg2: memref<128x512xbf16, #tpu.memory_space<vmem>>, %arg3: memref<1x512xf32, #tpu.memory_space<vmem>>, %arg4: memref<128x512xf32, #tpu.memory_space<vmem>>) attributes {dimension_semantics = [#tpu.dimension_semantics<parallel>], iteration_bounds = array<i64: 1>, scalar_prefetch = 0 : i64, scratch_operands = 0 : i64, tpu.core_type = #tpu.core_type<tc>, window_params = [{transform_indices = @transform_0, window_bounds = array<i64: 128, 128>}, {pipeline_mode = #tpu.pipeline_mode<synchronous>, transform_indices = @transform_1, window_bounds = array<i64: 128, 512>}, {pipeline_mode = #tpu.pipeline_mode<synchronous>, transform_indices = @transform_2, window_bounds = array<i64: 1, 512>}, {transform_indices = @transform_3, window_bounds = array<i64: 128, 512>}]} {
    %c0 = arith.constant 0 : index
    %c0_0 = arith.constant 0 : index
    %0 = vector.load %arg2[%c0, %c0_0] : memref<128x512xbf16, #tpu.memory_space<vmem>>, vector<128x512xbf16>
    %c0_1 = arith.constant 0 : index
    %c0_2 = arith.constant 0 : index
    %1 = vector.load %arg1[%c0_1, %c0_2] : memref<128x128xf32, #tpu.memory_space<vmem>>, vector<128x128xf32>
    %2 = arith.truncf %1 : vector<128x128xf32> to vector<128x128xbf16>
    %cst = arith.constant dense<0.000000e+00> : vector<128x512xf32>
    %3 = tpu.matmul %2, %0, %cst {dimension_numbers = #tpu.dot_dimension_numbers<[1], [0], [0], [1], [0, 0, 1, 1], [], []>} : vector<128x128xbf16>, vector<128x512xbf16>, vector<128x512xf32> -> vector<128x512xf32>
    %c0_3 = arith.constant 0 : index
    %c0_4 = arith.constant 0 : index
    %4 = vector.load %arg3[%c0_3, %c0_4] : memref<1x512xf32, #tpu.memory_space<vmem>>, vector<1x512xf32>
    %5 = vector.broadcast %4 : vector<1x512xf32> to vector<128x512xf32>
    %6 = arith.addf %3, %5 : vector<128x512xf32>
    %c0_5 = arith.constant 0 : index
    %c0_6 = arith.constant 0 : index
    %7 = vector.load %arg4[%c0_5, %c0_6] : memref<128x512xf32, #tpu.memory_space<vmem>>, vector<128x512xf32>
    tpu.vector_store %arg4[%c0_5, %c0_6], %6 {strides = array<i32>} : memref<128x512xf32, #tpu.memory_space<vmem>>, vector<128x512xf32>,
    return
  }
  func.func @transform_0(%arg0: i32) -> (i32, i32) {
    %c0_i32 = arith.constant 0 : i32
    %c0_i32_0 = arith.constant 0 : i32
    return %arg0, %c0_i32 : i32, i32
  }
  func.func @transform_1(%arg0: i32) -> (i32, i32) {
    %c0_i32 = arith.constant 0 : i32
    %c0_i32_0 = arith.constant 0 : i32
    %c0_i32_1 = arith.constant 0 : i32
    return %c0_i32, %c0_i32_0 : i32, i32
  }
  func.func @transform_2(%arg0: i32) -> (i32, i32) {
    %c0_i32 = arith.constant 0 : i32
    %c0_i32_0 = arith.constant 0 : i32
    %c0_i32_1 = arith.constant 0 : i32
    return %c0_i32, %c0_i32_0 : i32, i32
  }
  func.func @transform_3(%arg0: i32) -> (i32, i32) {
    %c0_i32 = arith.constant 0 : i32
    %c0_i32_0 = arith.constant 0 : i32
    return %arg0, %c0_i32 : i32, i32
  }
}

</mosaic_0001>

<bundles_post_ra>
// kernel: tpu_custom_call.1
= control target key start
LH: loop header
LB: loop body
LE: loop exit
PB: predicated region body
PF: predicated region fallthrough
CT: control target
= control target key end

     0   :  { %8 = vsyncpa [#allocation3], 0  ;;  %s909_s0 = inlined_call_operand.hbm [shape: f32[128,128], index: 0, kind: input, shape index: {}]   ;;  %s910_s1 = inlined_call_operand.hbm [shape: bf16[128,512], index: 1, kind: input, shape index: {}]   ;;  %s911_s2 = inlined_call_operand.hbm [shape: f32[1,512], index: 2, kind: input, shape index: {}]   ;;  %s912_s3 = inlined_call_operand.hbm [shape: f32[128,512], index: 3, kind: output, shape index: {}]  }
   0x1   :  { %9 = vsyncpa [#allocation6], 0 }
   0x2   :  { %10 = vsyncpa [#allocation4], 0  ;;  %s778_s12 = smov [#allocation5]  }
   0x3   :  { %s28_s13 = sshll.u32 %s778_s12, 4  ;;  %s29_s13 = int_to_ptr.vmem [resolvable:$true] %s28_s13 }
   0x4   :  { %s700_s14 = scalar_lea.vmem %s29_s13, 4096  ;;  %p705_p1 = scmp.lt.s32.totalorder %s29_s13, %s29_s13 }
   0x5   :  { %p701_p0 = scmp.ne.s32.totalorder %s29_s13, %s700_s14  ;;  %p706_p2 = scmp.lt.s32.totalorder %s700_s14, %s700_s14 }
   0x7   :  { %p707_p3 = por %p706_p2, %p705_p1 }
   0x9   :  { %p708_p4 = pnand %p707_p3, %p701_p0 }
   0xb   :  { %711 = shalt.err (!%p708_p4)
}
   0xc   :  { %s779_s15 = smov 256   ;;  %s780_s16 = smov 16  }
   0xd   :  { %34 = dma.hbm_to_vmem [thread:$0]  %s910_s1, 4096, %s29_s13, [#allocation6], %s779_s15, %s779_s15, %s780_s16  }
   0xe   :  { %s781_s19 = smov [#allocation2]  }
   0xf   :  { %s16_s20 = sshll.u32 %s781_s19, 4  ;;  %s17_s20 = int_to_ptr.vmem [resolvable:$true] %s16_s20 }
  0x10   :  { %s720_s21 = scalar_lea.vmem %s17_s20, 2048  ;;  %p725_p6 = scmp.lt.s32.totalorder %s17_s20, %s17_s20 }
  0x11   :  { %p721_p5 = scmp.ne.s32.totalorder %s17_s20, %s720_s21  ;;  %p726_p7 = scmp.lt.s32.totalorder %s720_s21, %s720_s21 }
  0x13   :  { %p727_p8 = por %p726_p7, %p725_p6 }
  0x15   :  { %p728_p9 = pnand %p727_p8, %p721_p5 }
  0x17   :  { %731 = shalt.err (!%p728_p9)
}
  0x18   :  { %s782_s22 = smov 128   ;;  %s783_s23 = smov 8  }
  0x19   :  { %22 = dma.hbm_to_vmem [thread:$0]  %s909_s0, 2048, %s17_s20, [#allocation3], %s782_s22, %s782_s22, %s783_s23  }
  0x1a   :  { %s784_s26 = smov [#allocation7]  }
  0x1b   :  { %s41_s27 = sshll.u32 %s784_s26, 4  ;;  %s42_s27 = int_to_ptr.vmem [resolvable:$true] %s41_s27 }
  0x1c   :  { %s740_s1 = scalar_lea.vmem %s42_s27, 64  ;;  %p745_p11 = scmp.lt.s32.totalorder %s42_s27, %s42_s27 }
  0x1d   :  { %p741_p10 = scmp.ne.s32.totalorder %s42_s27, %s740_s1  ;;  %p746_p12 = scmp.lt.s32.totalorder %s740_s1, %s740_s1 }
  0x1f   :  { %p747_p13 = por %p746_p12, %p745_p11 }
  0x21   :  { %p748_p0 = pnand %p747_p13, %p741_p10 }
  0x23   :  { %751 = shalt.err (!%p748_p0)
}
  0x24   :  { %44 = dma.hbm_to_vmem [thread:$0]  %s911_s2, 64, %s42_s27, [#allocation6]  }
  0x25   :  { %772 = dma.done.wait [#allocation3], 2048  }
  0x26   :  { %773 = vsyncadd [#allocation3], 4294965248 }
  0x27   :  { %774 = dma.done.wait [#allocation6], 4160  }
  0x28   :  { %775 = vsyncadd [#allocation6], 4294963136  ;;  %v785_v0 = vmov 0   ;;  %v644_v1 = vld [vmem:[#allocation5 + $0xe4] ss:$16 sps:$4 sm:$0xff]   ;;  %v88_v34 = vld [vmem:[#allocation2 + $0x8] sm:$0xff]  ;;  %v113_v57 = vlaneseq }
  0x29   :  { %325 = vmatprep.mubr.bf16.mxu0 %v785_v0  ;;  %438 = vmatprep.mubr.bf16.mxu1 %v785_v0  ;;  %v646_v2 = vld [vmem:[#allocation5 + $0xec] ss:$16 sps:$4 sm:$0xff]   ;;  %v648_v3 = vld [vmem:[#allocation5 + $0xe0] ss:$16 sps:$4 sm:$0xff]   ;;  %v649_v4 = vld [vmem:[#allocation5 + $0xe8] ss:$16 sps:$4 sm:$0xff]  }
  0x2a   :  { %293 = vmatprep.subr.bf16.mxu0 %v644_v1  ;;  %406 = vmatprep.subr.bf16.mxu1 %v646_v2  ;;  %v650_v5 = vld [vmem:[#allocation5 + $0xc4] ss:$16 sps:$4 sm:$0xff]   ;;  %v652_v6 = vld [vmem:[#allocation5 + $0xcc] ss:$16 sps:$4 sm:$0xff]   ;;  %v654_v7 = vld [vmem:[#allocation5 + $0xc0] ss:$16 sps:$4 sm:$0xff]  }
  0x2b   :  { %294 = vmatpush1.bf16.msra.mxu0 %v648_v3  ;;  %407 = vmatpush1.bf16.msra.mxu1 %v649_v4  ;;  %v655_v8 = vld [vmem:[#allocation5 + $0xc8] ss:$16 sps:$4 sm:$0xff]   ;;  %v656_v9 = vld [vmem:[#allocation5 + $0xa4] ss:$16 sps:$4 sm:$0xff]   ;;  %v658_v10 = vld [vmem:[#allocation5 + $0xac] ss:$16 sps:$4 sm:$0xff]  }
  0x2c   :  { %295 = vmatprep.subr.bf16.mxu0 %v650_v5  ;;  %408 = vmatprep.subr.bf16.mxu1 %v652_v6  ;;  %v660_v11 = vld [vmem:[#allocation5 + $0xa0] ss:$16 sps:$4 sm:$0xff]   ;;  %v661_v12 = vld [vmem:[#allocation5 + $0xa8] ss:$16 sps:$4 sm:$0xff]   ;;  %v662_v13 = vld [vmem:[#allocation5 + $0x84] ss:$16 sps:$4 sm:$0xff]  }
  0x2d   :  { %v664_v14 = vld [vmem:[#allocation5 + $0x8c] ss:$16 sps:$4 sm:$0xff]   ;;  %v666_v15 = vld [vmem:[#allocation5 + $0x80] ss:$16 sps:$4 sm:$0xff]   ;;  %v667_v16 = vld [vmem:[#allocation5 + $0x88] ss:$16 sps:$4 sm:$0xff]  }
  0x2e   :  { %v668_v17 = vld [vmem:[#allocation5 + $0x64] ss:$16 sps:$4 sm:$0xff]   ;;  %v670_v18 = vld [vmem:[#allocation5 + $0x6c] ss:$16 sps:$4 sm:$0xff]   ;;  %v672_v19 = vld [vmem:[#allocation5 + $0x60] ss:$16 sps:$4 sm:$0xff]  }
  0x2f   :  { %296 = vmatpush1.bf16.msra.mxu0 %v654_v7  ;;  %409 = vmatpush1.bf16.msra.mxu1 %v655_v8  ;;  %v673_v20 = vld [vmem:[#allocation5 + $0x68] ss:$16 sps:$4 sm:$0xff]   ;;  %v674_v21 = vld [vmem:[#allocation5 + $0x44] ss:$16 sps:$4 sm:$0xff]   ;;  %v676_v22 = vld [vmem:[#allocation5 + $0x4c] ss:$16 sps:$4 sm:$0xff]  }
  0x30   :  { %297 = vmatprep.subr.bf16.mxu0 %v656_v9  ;;  %410 = vmatprep.subr.bf16.mxu1 %v658_v10  ;;  %v678_v23 = vld [vmem:[#allocation5 + $0x40] ss:$16 sps:$4 sm:$0xff]   ;;  %v679_v24 = vld [vmem:[#allocation5 + $0x48] ss:$16 sps:$4 sm:$0xff]   ;;  %v680_v25 = vld [vmem:[#allocation5 + $0x24] ss:$16 sps:$4 sm:$0xff]  }
  0x31   :  { %v682_v26 = vld [vmem:[#allocation5 + $0x2c] ss:$16 sps:$4 sm:$0xff]   ;;  %v684_v27 = vld [vmem:[#allocation5 + $0x20] ss:$16 sps:$4 sm:$0xff]   ;;  %v685_v28 = vld [vmem:[#allocation5 + $0x28] ss:$16 sps:$4 sm:$0xff]  }
  0x32   :  { %v686_v29 = vld [vmem:[#allocation5 + $0x4] ss:$16 sps:$4 sm:$0xff]   ;;  %v688_v30 = vld [vmem:[#allocation5 + $0xc] ss:$16 sps:$4 sm:$0xff]   ;;  %v690_v31 = vld [vmem:[#allocation5] ss:$16 sps:$4 sm:$0xff]  }
  0x33   :  { %298 = vmatpush1.bf16.msra.mxu0 %v660_v11  ;;  %411 = vmatpush1.bf16.msra.mxu1 %v661_v12  ;;  %v691_v32 = vld [vmem:[#allocation5 + $0x8] ss:$16 sps:$4 sm:$0xff]   ;;  %v87_v33 = vld [vmem:[#allocation2] sm:$0xff]  ;;  %v89_v36 = vld [vmem:[#allocation2 + $0x10] sm:$0xff]  ;;  %v114_v58 = vshrl.u32 %v113_v57, 7  ;;  %s786_s0 = smov [#allocation8]  }
  0x34   :  { %299 = vmatprep.subr.bf16.mxu0 %v662_v13  ;;  %412 = vmatprep.subr.bf16.mxu1 %v664_v14  ;;  %v103_v35 = vpack.c.bf16 %v88_v34, %v87_v33  ;;  %v90_v37 = vld [vmem:[#allocation2 + $0x18] sm:$0xff]  ;;  %v91_v39 = vld [vmem:[#allocation2 + $0x20] sm:$0xff]  ;;  %v92_v40 = vld [vmem:[#allocation2 + $0x28] sm:$0xff]  ;;  %s588_s2 = sshll.u32 %s786_s0, 4  ;;  %s589_s2 = int_to_ptr.vmem [resolvable:$true] %s588_s2 }
  0x35   :  { %v104_v38 = vpack.c.bf16 %v90_v37, %v89_v36  ;;  %v105_v41 = vpack.c.bf16 %v92_v40, %v91_v39  ;;  %v93_v42 = vld [vmem:[#allocation2 + $0x30] sm:$0xff]  ;;  %v94_v43 = vld [vmem:[#allocation2 + $0x38] sm:$0xff]  ;;  %v95_v45 = vld [vmem:[#allocation2 + $0x40] sm:$0xff]  ;;  %v115_v59 = vsub.s32 0, %v114_v58  ;;  %v123_v60 = vsub.s32 2, %v114_v58  ;;  %s752_s30 = scalar_lea.vmem %s589_s2, 8192  ;;  %p757_p2 = scmp.lt.s32.totalorder %s589_s2, %s589_s2 }
  0x36   :  { %v106_v44 = vpack.c.bf16 %v94_v43, %v93_v42  ;;  %v96_v46 = vld [vmem:[#allocation2 + $0x48] sm:$0xff]  ;;  %v97_v48 = vld [vmem:[#allocation2 + $0x50] sm:$0xff]  ;;  %v98_v49 = vld [vmem:[#allocation2 + $0x58] sm:$0xff]  ;;  %v119_v62 = vsub.s32 1, %v114_v58  ;;  %v127_v63 = vsub.s32 3, %v114_v58  ;;  %p753_p1 = scmp.ne.s32.totalorder %s589_s2, %s752_s30  ;;  %p758_p3 = scmp.lt.s32.totalorder %s752_s30, %s752_s30 }
  0x37   :  { %300 = vmatpush1.bf16.msra.mxu0 %v666_v15  ;;  %413 = vmatpush1.bf16.msra.mxu1 %v667_v16  ;;  %v107_v47 = vpack.c.bf16 %v96_v46, %v95_v45  ;;  %v108_v50 = vpack.c.bf16 %v98_v49, %v97_v48  ;;  %v99_v51 = vld [vmem:[#allocation2 + $0x60] sm:$0xff]  ;;  %v100_v52 = vld [vmem:[#allocation2 + $0x68] sm:$0xff]  ;;  %v101_v54 = vld [vmem:[#allocation2 + $0x70] sm:$0xff] }
  0x38   :  { %301 = vmatprep.subr.bf16.mxu0 %v668_v17  ;;  %414 = vmatprep.subr.bf16.mxu1 %v670_v18  ;;  %v109_v53 = vpack.c.bf16 %v100_v52, %v99_v51  ;;  %v102_v55 = vld [vmem:[#allocation2 + $0x78] sm:$0xff]  ;;  %v111_v61 = vld [vmem:[#allocation7] sm:$0xf]  ;;  %p759_p4 = por %p758_p3, %p757_p2 }
  0x39   :  { %v110_v56 = vpack.c.bf16 %v102_v55, %v101_v54  ;;  %v834_v1 = vrot.slane %v111_v61, %v115_v59  ;;  %v836_v2 = vrot.slane %v111_v61, %v123_v60  ;;  %v838_v3 = vrot.slane %v111_v61, %v119_v62 }
  0x3a   :  { %v840_v4 = vrot.slane %v111_v61, %v127_v63  ;;  %p760_p5 = pnand %p759_p4, %p753_p1 }
  0x3b   :  { %302 = vmatpush1.bf16.msra.mxu0 %v672_v19  ;;  %415 = vmatpush1.bf16.msra.mxu1 %v673_v20 }
  0x3c   :  { %303 = vmatprep.subr.bf16.mxu0 %v674_v21  ;;  %416 = vmatprep.subr.bf16.mxu1 %v676_v22 }
  0x3f   :  { %304 = vmatpush1.bf16.msra.mxu0 %v678_v23  ;;  %417 = vmatpush1.bf16.msra.mxu1 %v679_v24 }
  0x40   :  { %305 = vmatprep.subr.bf16.mxu0 %v680_v25  ;;  %418 = vmatprep.subr.bf16.mxu1 %v682_v26 }
  0x43   :  { %306 = vmatpush1.bf16.msra.mxu0 %v684_v27  ;;  %419 = vmatpush1.bf16.msra.mxu1 %v685_v28 }
  0x44   :  { %307 = vmatprep.subr.bf16.mxu0 %v686_v29  ;;  %420 = vmatprep.subr.bf16.mxu1 %v688_v30 }
  0x47   :  { %308 = vmatpush1.bf16.msra.mxu0 %v690_v31  ;;  %421 = vmatpush1.bf16.msra.mxu1 %v691_v32 }
  0x4a   :  { %326 = vmatmul.mubr.bf16.vlgmr.msra.gmra.mxu0 %v103_v35  ;;  %439 = vmatmul.mubr.bf16.vlgmr.msra.gmra.mxu1 %v103_v35 }
  0x4b   :  { %335 = vmatprep.mubr.bf16.mxu0 %v785_v0  ;;  %448 = vmatprep.mubr.bf16.mxu1 %v785_v0 }
  0x52   :  { %336 = vmatmul.mubr.bf16.gmra.mxu0 %v104_v38  ;;  %449 = vmatmul.mubr.bf16.gmra.mxu1 %v104_v38 }
  0x53   :  { %345 = vmatprep.mubr.bf16.mxu0 %v785_v0  ;;  %458 = vmatprep.mubr.bf16.mxu1 %v785_v0 }
  0x5a   :  { %346 = vmatmul.mubr.bf16.gmra.mxu0 %v105_v41  ;;  %459 = vmatmul.mubr.bf16.gmra.mxu1 %v105_v41 }
  0x5b   :  { %355 = vmatprep.mubr.bf16.mxu0 %v785_v0  ;;  %468 = vmatprep.mubr.bf16.mxu1 %v785_v0 }
  0x62   :  { %356 = vmatmul.mubr.bf16.gmra.mxu0 %v106_v44  ;;  %469 = vmatmul.mubr.bf16.gmra.mxu1 %v106_v44 }
  0x63   :  { %365 = vmatprep.mubr.bf16.mxu0 %v785_v0  ;;  %478 = vmatprep.mubr.bf16.mxu1 %v785_v0 }
  0x6a   :  { %366 = vmatmul.mubr.bf16.gmra.mxu0 %v107_v47  ;;  %479 = vmatmul.mubr.bf16.gmra.mxu1 %v107_v47 }
  0x6b   :  { %375 = vmatprep.mubr.bf16.mxu0 %v785_v0  ;;  %488 = vmatprep.mubr.bf16.mxu1 %v785_v0 }
  0x72   :  { %376 = vmatmul.mubr.bf16.gmra.mxu0 %v108_v50  ;;  %489 = vmatmul.mubr.bf16.gmra.mxu1 %v108_v50 }
  0x73   :  { %385 = vmatprep.mubr.bf16.mxu0 %v785_v0  ;;  %498 = vmatprep.mubr.bf16.mxu1 %v785_v0 }
  0x7a   :  { %386 = vmatmul.mubr.bf16.gmra.mxu0 %v109_v53  ;;  %499 = vmatmul.mubr.bf16.gmra.mxu1 %v109_v53 }
  0x7b   :  { %395 = vmatprep.mubr.bf16.mxu0 %v785_v0  ;;  %508 = vmatprep.mubr.bf16.mxu1 %v785_v0 }
  0x82   :  { %396 = vmatmul.mubr.bf16.gmra.mxu0 %v110_v56  ;;  %509 = vmatmul.mubr.bf16.gmra.mxu1 %v110_v56 }
 0x10a   :  { %v327_v0 = vpop.f32.mrf.mxu0  ;;  %v440_v5 = vpop.f32.mrf.mxu1 }
 0x10b   :  { %v328_v6 = vadd.f32 %v327_v0, %v834_v1  ;;  %v441_v7 = vadd.f32 %v440_v5, %v836_v2 }
 0x10c   :  { %v329_v8 = vpop.f32.mrf.mxu0  ;;  %v442_v9 = vpop.f32.mrf.mxu1 }
 0x10d   :  { %519 = vst [vmem:[#allocation8] sm:$0xff] %v328_v6  ;;  %521 = vst [vmem:[#allocation8 + $0x10] sm:$0xff] %v441_v7  ;;  %v330_v10 = vadd.f32 %v329_v8, %v838_v3  ;;  %v443_v11 = vadd.f32 %v442_v9, %v840_v4 }
 0x10e   :  { %v331_v12 = vpop.f32.mrf.mxu0  ;;  %v444_v13 = vpop.f32.mrf.mxu1 }
 0x10f   :  { %520 = vst [vmem:[#allocation8 + $0x8] sm:$0xff] %v330_v10  ;;  %522 = vst [vmem:[#allocation8 + $0x18] sm:$0xff] %v443_v11  ;;  %v332_v14 = vadd.f32 %v331_v12, %v834_v1  ;;  %v445_v15 = vadd.f32 %v444_v13, %v836_v2 }
 0x110   :  { %v333_v16 = vpop.f32.mrf.mxu0  ;;  %v446_v17 = vpop.f32.mrf.mxu1 }
 0x111   :  { %523 = vst [vmem:[#allocation8 + $0x20] sm:$0xff] %v332_v14  ;;  %525 = vst [vmem:[#allocation8 + $0x30] sm:$0xff] %v445_v15  ;;  %v334_v18 = vadd.f32 %v333_v16, %v838_v3  ;;  %v447_v19 = vadd.f32 %v446_v17, %v840_v4 }
 0x112   :  { %v337_v20 = vpop.f32.mrf.mxu0  ;;  %v450_v21 = vpop.f32.mrf.mxu1 }
 0x113   :  { %524 = vst [vmem:[#allocation8 + $0x28] sm:$0xff] %v334_v18  ;;  %526 = vst [vmem:[#allocation8 + $0x38] sm:$0xff] %v447_v19  ;;  %v338_v22 = vadd.f32 %v337_v20, %v834_v1  ;;  %v451_v23 = vadd.f32 %v450_v21, %v836_v2 }
 0x114   :  { %v339_v24 = vpop.f32.mrf.mxu0  ;;  %v452_v25 = vpop.f32.mrf.mxu1 }
 0x115   :  { %527 = vst [vmem:[#allocation8 + $0x40] sm:$0xff] %v338_v22  ;;  %529 = vst [vmem:[#allocation8 + $0x50] sm:$0xff] %v451_v23  ;;  %v340_v26 = vadd.f32 %v339_v24, %v838_v3  ;;  %v453_v27 = vadd.f32 %v452_v25, %v840_v4 }
 0x116   :  { %v341_v28 = vpop.f32.mrf.mxu0  ;;  %v454_v29 = vpop.f32.mrf.mxu1 }
 0x117   :  { %528 = vst [vmem:[#allocation8 + $0x48] sm:$0xff] %v340_v26  ;;  %530 = vst [vmem:[#allocation8 + $0x58] sm:$0xff] %v453_v27  ;;  %v342_v30 = vadd.f32 %v341_v28, %v834_v1  ;;  %v455_v31 = vadd.f32 %v454_v29, %v836_v2 }
 0x118   :  { %v343_v32 = vpop.f32.mrf.mxu0  ;;  %v456_v33 = vpop.f32.mrf.mxu1 }
 0x119   :  { %531 = vst [vmem:[#allocation8 + $0x60] sm:$0xff] %v342_v30  ;;  %533 = vst [vmem:[#allocation8 + $0x70] sm:$0xff] %v455_v31  ;;  %v344_v34 = vadd.f32 %v343_v32, %v838_v3  ;;  %v457_v35 = vadd.f32 %v456_v33, %v840_v4 }
 0x11a   :  { %v347_v36 = vpop.f32.mrf.mxu0  ;;  %v460_v37 = vpop.f32.mrf.mxu1 }
 0x11b   :  { %532 = vst [vmem:[#allocation8 + $0x68] sm:$0xff] %v344_v34  ;;  %534 = vst [vmem:[#allocation8 + $0x78] sm:$0xff] %v457_v35  ;;  %v348_v38 = vadd.f32 %v347_v36, %v834_v1  ;;  %v461_v39 = vadd.f32 %v460_v37, %v836_v2 }
 0x11c   :  { %v349_v40 = vpop.f32.mrf.mxu0  ;;  %v462_v41 = vpop.f32.mrf.mxu1 }
 0x11d   :  { %535 = vst [vmem:[#allocation8 + $0x80] sm:$0xff] %v348_v38  ;;  %537 = vst [vmem:[#allocation8 + $0x90] sm:$0xff] %v461_v39  ;;  %v350_v42 = vadd.f32 %v349_v40, %v838_v3  ;;  %v463_v43 = vadd.f32 %v462_v41, %v840_v4 }
 0x11e   :  { %v351_v44 = vpop.f32.mrf.mxu0  ;;  %v464_v45 = vpop.f32.mrf.mxu1 }
 0x11f   :  { %536 = vst [vmem:[#allocation8 + $0x88] sm:$0xff] %v350_v42  ;;  %538 = vst [vmem:[#allocation8 + $0x98] sm:$0xff] %v463_v43  ;;  %v352_v46 = vadd.f32 %v351_v44, %v834_v1  ;;  %v465_v47 = vadd.f32 %v464_v45, %v836_v2 }
 0x120   :  { %v353_v48 = vpop.f32.mrf.mxu0  ;;  %v466_v49 = vpop.f32.mrf.mxu1 }
 0x121   :  { %539 = vst [vmem:[#allocation8 + $0xa0] sm:$0xff] %v352_v46  ;;  %541 = vst [vmem:[#allocation8 + $0xb0] sm:$0xff] %v465_v47  ;;  %v354_v50 = vadd.f32 %v353_v48, %v838_v3  ;;  %v467_v51 = vadd.f32 %v466_v49, %v840_v4 }
 0x122   :  { %v357_v52 = vpop.f32.mrf.mxu0  ;;  %v470_v53 = vpop.f32.mrf.mxu1 }
 0x123   :  { %540 = vst [vmem:[#allocation8 + $0xa8] sm:$0xff] %v354_v50  ;;  %542 = vst [vmem:[#allocation8 + $0xb8] sm:$0xff] %v467_v51  ;;  %v358_v54 = vadd.f32 %v357_v52, %v834_v1  ;;  %v471_v55 = vadd.f32 %v470_v53, %v836_v2 }
 0x124   :  { %v359_v56 = vpop.f32.mrf.mxu0  ;;  %v472_v57 = vpop.f32.mrf.mxu1 }
 0x125   :  { %543 = vst [vmem:[#allocation8 + $0xc0] sm:$0xff] %v358_v54  ;;  %545 = vst [vmem:[#allocation8 + $0xd0] sm:$0xff] %v471_v55  ;;  %v360_v58 = vadd.f32 %v359_v56, %v838_v3  ;;  %v473_v59 = vadd.f32 %v472_v57, %v840_v4 }
 0x126   :  { %v361_v60 = vpop.f32.mrf.mxu0  ;;  %v474_v61 = vpop.f32.mrf.mxu1 }
 0x127   :  { %544 = vst [vmem:[#allocation8 + $0xc8] sm:$0xff] %v360_v58  ;;  %546 = vst [vmem:[#allocation8 + $0xd8] sm:$0xff] %v473_v59  ;;  %v362_v62 = vadd.f32 %v361_v60, %v834_v1  ;;  %v475_v63 = vadd.f32 %v474_v61, %v836_v2 }
 0x128   :  { %v363_v0 = vpop.f32.mrf.mxu0  ;;  %v476_v5 = vpop.f32.mrf.mxu1 }
 0x129   :  { %547 = vst [vmem:[#allocation8 + $0xe0] sm:$0xff] %v362_v62  ;;  %549 = vst [vmem:[#allocation8 + $0xf0] sm:$0xff] %v475_v63  ;;  %v364_v6 = vadd.f32 %v363_v0, %v838_v3  ;;  %v477_v7 = vadd.f32 %v476_v5, %v840_v4 }
 0x12a   :  { %v367_v8 = vpop.f32.mrf.mxu0  ;;  %v480_v9 = vpop.f32.mrf.mxu1 }
 0x12b   :  { %548 = vst [vmem:[#allocation8 + $0xe8] sm:$0xff] %v364_v6  ;;  %550 = vst [vmem:[#allocation8 + $0xf8] sm:$0xff] %v477_v7  ;;  %v368_v10 = vadd.f32 %v367_v8, %v834_v1  ;;  %v481_v11 = vadd.f32 %v480_v9, %v836_v2 }
 0x12c   :  { %v369_v12 = vpop.f32.mrf.mxu0  ;;  %v482_v13 = vpop.f32.mrf.mxu1 }
 0x12d   :  { %551 = vst [vmem:[#allocation8 + $0x100] sm:$0xff] %v368_v10  ;;  %553 = vst [vmem:[#allocation8 + $0x110] sm:$0xff] %v481_v11  ;;  %v370_v14 = vadd.f32 %v369_v12, %v838_v3  ;;  %v483_v15 = vadd.f32 %v482_v13, %v840_v4 }
 0x12e   :  { %v371_v16 = vpop.f32.mrf.mxu0  ;;  %v484_v17 = vpop.f32.mrf.mxu1 }
 0x12f   :  { %552 = vst [vmem:[#allocation8 + $0x108] sm:$0xff] %v370_v14  ;;  %554 = vst [vmem:[#allocation8 + $0x118] sm:$0xff] %v483_v15  ;;  %v372_v18 = vadd.f32 %v371_v16, %v834_v1  ;;  %v485_v19 = vadd.f32 %v484_v17, %v836_v2 }
 0x130   :  { %v373_v20 = vpop.f32.mrf.mxu0  ;;  %v486_v21 = vpop.f32.mrf.mxu1 }
 0x131   :  { %555 = vst [vmem:[#allocation8 + $0x120] sm:$0xff] %v372_v18  ;;  %557 = vst [vmem:[#allocation8 + $0x130] sm:$0xff] %v485_v19  ;;  %v374_v22 = vadd.f32 %v373_v20, %v838_v3  ;;  %v487_v23 = vadd.f32 %v486_v21, %v840_v4 }
 0x132   :  { %v377_v24 = vpop.f32.mrf.mxu0  ;;  %v490_v25 = vpop.f32.mrf.mxu1 }
 0x133   :  { %556 = vst [vmem:[#allocation8 + $0x128] sm:$0xff] %v374_v22  ;;  %558 = vst [vmem:[#allocation8 + $0x138] sm:$0xff] %v487_v23  ;;  %v378_v26 = vadd.f32 %v377_v24, %v834_v1  ;;  %v491_v27 = vadd.f32 %v490_v25, %v836_v2 }
 0x134   :  { %v379_v28 = vpop.f32.mrf.mxu0  ;;  %v492_v29 = vpop.f32.mrf.mxu1 }
 0x135   :  { %559 = vst [vmem:[#allocation8 + $0x140] sm:$0xff] %v378_v26  ;;  %561 = vst [vmem:[#allocation8 + $0x150] sm:$0xff] %v491_v27  ;;  %v380_v30 = vadd.f32 %v379_v28, %v838_v3  ;;  %v493_v31 = vadd.f32 %v492_v29, %v840_v4 }
 0x136   :  { %v381_v32 = vpop.f32.mrf.mxu0  ;;  %v494_v33 = vpop.f32.mrf.mxu1 }
 0x137   :  { %560 = vst [vmem:[#allocation8 + $0x148] sm:$0xff] %v380_v30  ;;  %562 = vst [vmem:[#allocation8 + $0x158] sm:$0xff] %v493_v31  ;;  %v382_v34 = vadd.f32 %v381_v32, %v834_v1  ;;  %v495_v35 = vadd.f32 %v494_v33, %v836_v2 }
 0x138   :  { %v383_v36 = vpop.f32.mrf.mxu0  ;;  %v496_v37 = vpop.f32.mrf.mxu1 }
 0x139   :  { %563 = vst [vmem:[#allocation8 + $0x160] sm:$0xff] %v382_v34  ;;  %565 = vst [vmem:[#allocation8 + $0x170] sm:$0xff] %v495_v35  ;;  %v384_v38 = vadd.f32 %v383_v36, %v838_v3  ;;  %v497_v39 = vadd.f32 %v496_v37, %v840_v4 }
 0x13a   :  { %v387_v40 = vpop.f32.mrf.mxu0  ;;  %v500_v41 = vpop.f32.mrf.mxu1 }
 0x13b   :  { %564 = vst [vmem:[#allocation8 + $0x168] sm:$0xff] %v384_v38  ;;  %566 = vst [vmem:[#allocation8 + $0x178] sm:$0xff] %v497_v39  ;;  %v388_v42 = vadd.f32 %v387_v40, %v834_v1  ;;  %v501_v43 = vadd.f32 %v500_v41, %v836_v2 }
 0x13c   :  { %v389_v44 = vpop.f32.mrf.mxu0  ;;  %v502_v45 = vpop.f32.mrf.mxu1 }
 0x13d   :  { %567 = vst [vmem:[#allocation8 + $0x180] sm:$0xff] %v388_v42  ;;  %569 = vst [vmem:[#allocation8 + $0x190] sm:$0xff] %v501_v43  ;;  %v390_v46 = vadd.f32 %v389_v44, %v838_v3  ;;  %v503_v47 = vadd.f32 %v502_v45, %v840_v4 }
 0x13e   :  { %v391_v48 = vpop.f32.mrf.mxu0  ;;  %v504_v49 = vpop.f32.mrf.mxu1 }
 0x13f   :  { %568 = vst [vmem:[#allocation8 + $0x188] sm:$0xff] %v390_v46  ;;  %570 = vst [vmem:[#allocation8 + $0x198] sm:$0xff] %v503_v47  ;;  %v392_v50 = vadd.f32 %v391_v48, %v834_v1  ;;  %v505_v51 = vadd.f32 %v504_v49, %v836_v2 }
 0x140   :  { %v393_v52 = vpop.f32.mrf.mxu0  ;;  %v506_v53 = vpop.f32.mrf.mxu1 }
 0x141   :  { %571 = vst [vmem:[#allocation8 + $0x1a0] sm:$0xff] %v392_v50  ;;  %573 = vst [vmem:[#allocation8 + $0x1b0] sm:$0xff] %v505_v51  ;;  %v394_v54 = vadd.f32 %v393_v52, %v838_v3  ;;  %v507_v55 = vadd.f32 %v506_v53, %v840_v4 }
 0x142   :  { %v397_v56 = vpop.f32.mrf.mxu0  ;;  %v510_v57 = vpop.f32.mrf.mxu1 }
 0x143   :  { %572 = vst [vmem:[#allocation8 + $0x1a8] sm:$0xff] %v394_v54  ;;  %574 = vst [vmem:[#allocation8 + $0x1b8] sm:$0xff] %v507_v55  ;;  %v398_v58 = vadd.f32 %v397_v56, %v834_v1  ;;  %v511_v59 = vadd.f32 %v510_v57, %v836_v2 }
 0x144   :  { %v399_v60 = vpop.f32.mrf.mxu0  ;;  %v512_v61 = vpop.f32.mrf.mxu1 }
 0x145   :  { %575 = vst [vmem:[#allocation8 + $0x1c0] sm:$0xff] %v398_v58  ;;  %577 = vst [vmem:[#allocation8 + $0x1d0] sm:$0xff] %v511_v59  ;;  %v400_v62 = vadd.f32 %v399_v60, %v838_v3  ;;  %v513_v63 = vadd.f32 %v512_v61, %v840_v4 }
 0x146   :  { %v401_v0 = vpop.f32.mrf.mxu0  ;;  %v514_v5 = vpop.f32.mrf.mxu1 }
 0x147   :  { %576 = vst [vmem:[#allocation8 + $0x1c8] sm:$0xff] %v400_v62  ;;  %578 = vst [vmem:[#allocation8 + $0x1d8] sm:$0xff] %v513_v63  ;;  %v402_v6 = vadd.f32 %v401_v0, %v834_v1  ;;  %v515_v7 = vadd.f32 %v514_v5, %v836_v2 }
 0x148   :  { %v403_v8 = vpop.f32.mrf.mxu0  ;;  %v516_v9 = vpop.f32.mrf.mxu1 }
 0x149   :  { %579 = vst [vmem:[#allocation8 + $0x1e0] sm:$0xff] %v402_v6  ;;  %581 = vst [vmem:[#allocation8 + $0x1f0] sm:$0xff] %v515_v7  ;;  %v404_v10 = vadd.f32 %v403_v8, %v838_v3  ;;  %v517_v11 = vadd.f32 %v516_v9, %v840_v4 }
 0x14b   :  { %580 = vst [vmem:[#allocation8 + $0x1e8] sm:$0xff] %v404_v10  ;;  %582 = vst [vmem:[#allocation8 + $0x1f8] sm:$0xff] %v517_v11 }
 0x14c   :  { %763 = shalt.err (!%p760_p5)
}
 0x14d   :  { %s787_s4 = smov 512   ;;  %s788_s5 = smov 32  }
 0x14e   :  { %594 = dma.vmem_to_hbm [thread:$0]  %s589_s2, 8192, %s912_s3, [#allocation4], %s787_s4, %s787_s4, %s788_s5  }
 0x14f   :  { %776 = dma.done.wait [#allocation4], 8192  }
 0x150   :  { %777 = vsyncadd [#allocation4], 4294959104 }
 0x151   :  { %598 = vsyncpa [#allocation3], 1 }
 0x152   :  { %599 = vsyncpa [#allocation6], 1 }
 0x153   :  { %600 = vsyncpa [#allocation4], 1 }

</bundles_post_ra>
